<compile_context>
chip_gen: v6e
topology: v6e:2x2x1
jax: 0.10.0
libtpu: 0.0.40
codegen_flags: <defaults>
</compile_context>

<pallas_src>
import jax
import jax.numpy as jnp
from jax import lax
from jax.experimental import pallas as pl
from jax.experimental.pallas import tpu as pltpu


def _make_kernel(in_dim: int, hidden: int, compute_dtype=jnp.float32):
    del hidden  # shapes are carried by the refs

    def kernel(xT_ref, w1T_ref, b1_ref, wh1T_ref, bh1_ref, wh2T_ref, bh2_ref,
               out_ref):
        # Batch-on-lanes layout: every activation is (features, TB).
        xT = xT_ref[...]                                   # (in_dim, TB)

        # ---- trunk: Linear(in, H) + ReLU  ->  h: (H, TB) ----------------
        w1T = w1T_ref[...]                                 # (H, in_dim)
        if in_dim == 1:
            # rank-1 outer product: pure VPU broadcast, skip the MXU
            h = w1T * xT + b1_ref[...]
        else:
            h = jnp.dot(w1T, xT,
                        preferred_element_type=jnp.float32) + b1_ref[...]
        h = jnp.maximum(h, 0.0)

        # ---- fused head first layers: ONE (2H, H) @ (H, TB) MXU matmul --
        hh = jnp.dot(wh1T_ref[...].astype(compute_dtype),
                     h.astype(compute_dtype),
                     preferred_element_type=jnp.float32) + bh1_ref[...]
        hh = jnp.maximum(hh, 0.0)                          # (2H, TB)

        # ---- fused head second layers: block-diagonal (2, 2H) @ (2H, TB)
        out = jnp.dot(wh2T_ref[...], hh,
                      preferred_element_type=jnp.float32) + bh2_ref[...]  # (2, TB)

        # Softplus (beta=1, threshold=20) selected onto the sigma row only.
        # (Matches PyTorch: strongly-negative inputs may underflow to 0.0,
        #  exactly as F.softplus does in f32.)
        sp = jnp.where(out > 20.0, out,
                       jnp.log1p(jnp.exp(jnp.minimum(out, 20.0))))
        row = lax.broadcasted_iota(jnp.int32, out.shape, 0)
        out_ref[...] = jnp.where(row == 0, out, sp).astype(out_ref.dtype)

    return kernel


def pack_params(p):
    """Host-side, one-time packing into the transposed (feature-major) layout."""
    H = p["w1"].shape[1]
    w1T = p["w1"].T                                               # (H, in_dim)
    b1 = p["b1"].T                                                # (H, 1)
    wh1T = jnp.concatenate([p["wm1"].T, p["ws1"].T], axis=0)      # (2H, H)
    bh1 = jnp.concatenate([p["bm1"].T, p["bs1"].T], axis=0)       # (2H, 1)
    z = jnp.zeros((1, H), jnp.float32)
    wh2T = jnp.concatenate([                                      # (2, 2H)
        jnp.concatenate([p["wm2"].T, z], axis=1),
        jnp.concatenate([z, p["ws2"].T], axis=1)], axis=0)
    bh2 = jnp.concatenate([p["bm2"].T, p["bs2"].T], axis=0)       # (2, 1)
    return w1T, b1, wh1T, bh1, wh2T, bh2


def _pick_tile(B: int, target: int) -> int:
    """Lane-tile picker: whole batch when tiny; otherwise a multiple of 128
    that prefers (a) exactly dividing B (no pad copy) and (b) grid >= 2 so a
    v7x chip can shard the batch axis across both TensorCores."""
    if B <= 256:
        return B
    cap = max(128, min(target, B // 2))
    cap = max(128, (cap // 128) * 128)
    for tb in range(cap, 127, -128):
        if B % tb == 0:
            return tb
    return cap  # fall back: last tile is padded


def model_forward(x, params, *, tile_b=4096, compute_dtype=jnp.float32):
    """Returns (mu, sigma) — the Normal-distribution parameters the PyTorch
    module would wrap in D.Normal(mu, sigma)."""
    B, in_dim = x.shape
    hidden = params["w1"].shape[1]
    packed = pack_params(params)

    xT = x.T                         # (in_dim, B); a free reshape when in_dim==1
    tb = _pick_tile(B, tile_b)
    n_blk = -(-B // tb)
    Bp = n_blk * tb
    if Bp != B:                      # only when no 128-multiple divisor exists
        xT = jnp.pad(xT, ((0, 0), (0, Bp - B)))

    kernel = _make_kernel(in_dim, hidden, compute_dtype)
    weight_specs = [pl.BlockSpec(w.shape, lambda i: (0, 0)) for w in packed]

    out = pl.pallas_call(
        kernel,
        out_shape=jax.ShapeDtypeStruct((2, Bp), jnp.float32),
        grid_spec=pltpu.PrefetchScalarGridSpec(
            num_scalar_prefetch=0,
            grid=(n_blk,),
            in_specs=[pl.BlockSpec((in_dim, tb), lambda i: (0, i))]  # x tile
                     + weight_specs,                                 # resident
            out_specs=pl.BlockSpec((2, tb), lambda i: (0, i)),       # lane-dense
        ),
        compiler_params=pltpu.CompilerParams(
            dimension_semantics=("parallel",),
            vmem_limit_bytes=32 * 1024 * 1024,
        ),
    )(xT, *packed)

    mu = out[0, :B].reshape(B, 1)
    sigma = out[1, :B].reshape(B, 1)
    return mu, sigma


def init_params(key, input_dim=1, hidden=64):
    """Deterministic init mimicking PyTorch Linear default U(-1/sqrt(fan_in), +)."""
    def linear(k, fan_in, fan_out):
        kw, kb = jax.random.split(k)
        bound = 1.0 / jnp.sqrt(fan_in)
        w = jax.random.uniform(kw, (fan_in, fan_out), jnp.float32, -bound, bound)
        b = jax.random.uniform(kb, (1, fan_out), jnp.float32, -bound, bound)
        return w, b

    k1, k2, k3, k4, k5 = jax.random.split(key, 5)
    w1, b1 = linear(k1, input_dim, hidden)     # model: Linear(input, hidden)
    wm1, bm1 = linear(k2, hidden, hidden)      # mu:    Linear(hidden, hidden)
    wm2, bm2 = linear(k3, hidden, 1)           # mu:    Linear(hidden, 1)
    ws1, bs1 = linear(k4, hidden, hidden)      # sigma: Linear(hidden, hidden)
    ws2, bs2 = linear(k5, hidden, 1)           # sigma: Linear(hidden, 1)
    return dict(w1=w1, b1=b1, wm1=wm1, bm1=bm1, wm2=wm2, bm2=bm2,
                ws1=ws1, bs1=bs1, ws2=ws2, bs2=bs2)


def reference_forward(x, p):
    h = jnp.maximum(x @ p["w1"] + p["b1"], 0.0)
    hm = jnp.maximum(h @ p["wm1"] + p["bm1"], 0.0)
    mu = hm @ p["wm2"] + p["bm2"]
    hs = jnp.maximum(h @ p["ws1"] + p["bs1"], 0.0)
    s = hs @ p["ws2"] + p["bs2"]
    sigma = jnp.where(s > 20.0, s, jnp.log1p(jnp.exp(jnp.minimum(s, 20.0))))
    return mu, sigma


if __name__ == "__main__":
    key = jax.random.PRNGKey(0)
    kp, kx = jax.random.split(key)
    INPUT, HIDDEN = 1, 64
    params = init_params(kp, input_dim=INPUT, hidden=HIDDEN)

    # Small whole-batch path (B=8) and the tiled / grid=2 path (B=512).
    for B in (8, 512):
        x = jax.random.normal(jax.random.fold_in(kx, B), (B, INPUT), jnp.float32)
        mu, sigma = model_forward(x, params)
        jax.block_until_ready((mu, sigma))

        mu_ref, sigma_ref = reference_forward(x, params)
        assert mu.shape == (B, 1) and sigma.shape == (B, 1)
        assert jnp.allclose(mu, mu_ref, atol=1e-5, rtol=1e-5)
        assert jnp.allclose(sigma, sigma_ref, atol=1e-5, rtol=1e-5)
        assert bool(jnp.all(sigma > 0))  # valid Normal scale

    # TODO(synk): torch.distributions.Normal itself has no Pallas equivalent;
    # the kernel returns (mu, sigma), the distribution's parameters.
    print("KERNEL_OK")
</pallas_src>

<mosaic_0001>
module attributes {stable_mosaic.version = 11 : i64} {
  func.func @kernel(%arg0: i32, %arg1: memref<1x8xf32, #tpu.memory_space<vmem>>, %arg2: memref<64x1xf32, #tpu.memory_space<vmem>>, %arg3: memref<64x1xf32, #tpu.memory_space<vmem>>, %arg4: memref<128x64xf32, #tpu.memory_space<vmem>>, %arg5: memref<128x1xf32, #tpu.memory_space<vmem>>, %arg6: memref<2x128xf32, #tpu.memory_space<vmem>>, %arg7: memref<2x1xf32, #tpu.memory_space<vmem>>, %arg8: memref<2x8xf32, #tpu.memory_space<vmem>>) attributes {dimension_semantics = [#tpu.dimension_semantics<parallel>], iteration_bounds = array<i64: 1>, scalar_prefetch = 0 : i64, scratch_operands = 0 : i64, tpu.core_type = #tpu.core_type<tc>, window_params = [{transform_indices = @transform_0, window_bounds = array<i64: 1, 8>}, {pipeline_mode = #tpu.pipeline_mode<synchronous>, transform_indices = @transform_1, window_bounds = array<i64: 64, 1>}, {pipeline_mode = #tpu.pipeline_mode<synchronous>, transform_indices = @transform_2, window_bounds = array<i64: 64, 1>}, {pipeline_mode = #tpu.pipeline_mode<synchronous>, transform_indices = @transform_3, window_bounds = array<i64: 128, 64>}, {pipeline_mode = #tpu.pipeline_mode<synchronous>, transform_indices = @transform_4, window_bounds = array<i64: 128, 1>}, {pipeline_mode = #tpu.pipeline_mode<synchronous>, transform_indices = @transform_5, window_bounds = array<i64: 2, 128>}, {pipeline_mode = #tpu.pipeline_mode<synchronous>, transform_indices = @transform_6, window_bounds = array<i64: 2, 1>}, {transform_indices = @transform_7, window_bounds = array<i64: 2, 8>}]} {
    %c0 = arith.constant 0 : index
    %c0_0 = arith.constant 0 : index
    %0 = vector.load %arg1[%c0, %c0_0] : memref<1x8xf32, #tpu.memory_space<vmem>>, vector<1x8xf32>
    %c0_1 = arith.constant 0 : index
    %c0_2 = arith.constant 0 : index
    %1 = vector.load %arg2[%c0_1, %c0_2] : memref<64x1xf32, #tpu.memory_space<vmem>>, vector<64x1xf32>
    %2 = vector.broadcast %1 : vector<64x1xf32> to vector<64x8xf32>
    %3 = vector.broadcast %0 : vector<1x8xf32> to vector<64x8xf32>
    %4 = arith.mulf %2, %3 : vector<64x8xf32>
    %c0_3 = arith.constant 0 : index
    %c0_4 = arith.constant 0 : index
    %5 = vector.load %arg3[%c0_3, %c0_4] : memref<64x1xf32, #tpu.memory_space<vmem>>, vector<64x1xf32>
    %6 = vector.broadcast %5 : vector<64x1xf32> to vector<64x8xf32>
    %7 = arith.addf %4, %6 : vector<64x8xf32>
    %cst = arith.constant 0.000000e+00 : f32
    %8 = vector.broadcast %cst : f32 to vector<64x8xf32>
    %9 = arith.maximumf %7, %8 : vector<64x8xf32>
    %c0_5 = arith.constant 0 : index
    %c0_6 = arith.constant 0 : index
    %10 = vector.load %arg4[%c0_5, %c0_6] : memref<128x64xf32, #tpu.memory_space<vmem>>, vector<128x64xf32>
    %cst_7 = arith.constant dense<0.000000e+00> : vector<128x8xf32>
    %11 = tpu.matmul %10, %9, %cst_7 {dimension_numbers = #tpu.dot_dimension_numbers<[1], [0], [0], [1], [0, 0, 1, 1], [], []>} : vector<128x64xf32>, vector<64x8xf32>, vector<128x8xf32> -> vector<128x8xf32>
    %c0_8 = arith.constant 0 : index
    %c0_9 = arith.constant 0 : index
    %12 = vector.load %arg5[%c0_8, %c0_9] : memref<128x1xf32, #tpu.memory_space<vmem>>, vector<128x1xf32>
    %13 = vector.broadcast %12 : vector<128x1xf32> to vector<128x8xf32>
    %14 = arith.addf %11, %13 : vector<128x8xf32>
    %cst_10 = arith.constant 0.000000e+00 : f32
    %15 = vector.broadcast %cst_10 : f32 to vector<128x8xf32>
    %16 = arith.maximumf %14, %15 : vector<128x8xf32>
    %c0_11 = arith.constant 0 : index
    %c0_12 = arith.constant 0 : index
    %17 = vector.load %arg6[%c0_11, %c0_12] : memref<2x128xf32, #tpu.memory_space<vmem>>, vector<2x128xf32>
    %cst_13 = arith.constant dense<0.000000e+00> : vector<2x8xf32>
    %18 = tpu.matmul %17, %16, %cst_13 {dimension_numbers = #tpu.dot_dimension_numbers<[1], [0], [0], [1], [0, 0, 1, 1], [], []>} : vector<2x128xf32>, vector<128x8xf32>, vector<2x8xf32> -> vector<2x8xf32>
    %c0_14 = arith.constant 0 : index
    %c0_15 = arith.constant 0 : index
    %19 = vector.load %arg7[%c0_14, %c0_15] : memref<2x1xf32, #tpu.memory_space<vmem>>, vector<2x1xf32>
    %20 = vector.broadcast %19 : vector<2x1xf32> to vector<2x8xf32>
    %21 = arith.addf %18, %20 : vector<2x8xf32>
    %cst_16 = arith.constant 2.000000e+01 : f32
    %22 = vector.broadcast %cst_16 : f32 to vector<2x8xf32>
    %23 = arith.cmpf ogt, %21, %22 : vector<2x8xf32>
    %cst_17 = arith.constant 2.000000e+01 : f32
    %24 = vector.broadcast %cst_17 : f32 to vector<2x8xf32>
    %25 = arith.minimumf %21, %24 : vector<2x8xf32>
    %26 = math.exp %25 : vector<2x8xf32>
    %27 = math.log1p %26 : vector<2x8xf32>
    %28 = arith.select %23, %21, %27 : vector<2x8xi1>, vector<2x8xf32>
    %29 = tpu.iota {dimensions = array<i32: 0>} : vector<2x8xi32>
    %c0_i32 = arith.constant 0 : i32
    %30 = vector.broadcast %c0_i32 : i32 to vector<2x8xi32>
    %31 = arith.cmpi eq, %29, %30 : vector<2x8xi32>
    %32 = arith.select %31, %21, %28 : vector<2x8xi1>, vector<2x8xf32>
    %c0_18 = arith.constant 0 : index
    %c0_19 = arith.constant 0 : index
    %33 = vector.load %arg8[%c0_18, %c0_19] : memref<2x8xf32, #tpu.memory_space<vmem>>, vector<2x8xf32>
    tpu.vector_store %arg8[%c0_18, %c0_19], %32 {strides = array<i32>} : memref<2x8xf32, #tpu.memory_space<vmem>>, vector<2x8xf32>,
    return
  }
  func.func @transform_0(%arg0: i32) -> (i32, i32) {
    %c0_i32 = arith.constant 0 : i32
    %c0_i32_0 = arith.constant 0 : i32
    return %c0_i32, %arg0 : i32, i32
  }
  func.func @transform_1(%arg0: i32) -> (i32, i32) {
    %c0_i32 = arith.constant 0 : i32
    %c0_i32_0 = arith.constant 0 : i32
    %c0_i32_1 = arith.constant 0 : i32
    return %c0_i32, %c0_i32_0 : i32, i32
  }
  func.func @transform_2(%arg0: i32) -> (i32, i32) {
    %c0_i32 = arith.constant 0 : i32
    %c0_i32_0 = arith.constant 0 : i32
    %c0_i32_1 = arith.constant 0 : i32
    return %c0_i32, %c0_i32_0 : i32, i32
  }
  func.func @transform_3(%arg0: i32) -> (i32, i32) {
    %c0_i32 = arith.constant 0 : i32
    %c0_i32_0 = arith.constant 0 : i32
    %c0_i32_1 = arith.constant 0 : i32
    return %c0_i32, %c0_i32_0 : i32, i32
  }
  func.func @transform_4(%arg0: i32) -> (i32, i32) {
    %c0_i32 = arith.constant 0 : i32
    %c0_i32_0 = arith.constant 0 : i32
    %c0_i32_1 = arith.constant 0 : i32
    return %c0_i32, %c0_i32_0 : i32, i32
  }
  func.func @transform_5(%arg0: i32) -> (i32, i32) {
    %c0_i32 = arith.constant 0 : i32
    %c0_i32_0 = arith.constant 0 : i32
    %c0_i32_1 = arith.constant 0 : i32
    return %c0_i32, %c0_i32_0 : i32, i32
  }
  func.func @transform_6(%arg0: i32) -> (i32, i32) {
    %c0_i32 = arith.constant 0 : i32
    %c0_i32_0 = arith.constant 0 : i32
    %c0_i32_1 = arith.constant 0 : i32
    return %c0_i32, %c0_i32_0 : i32, i32
  }
  func.func @transform_7(%arg0: i32) -> (i32, i32) {
    %c0_i32 = arith.constant 0 : i32
    %c0_i32_0 = arith.constant 0 : i32
    return %c0_i32, %arg0 : i32, i32
  }
}

</mosaic_0001>

<bundles_post_ra>
// kernel: tpu_custom_call.1
= control target key start
LH: loop header
LB: loop body
LE: loop exit
PB: predicated region body
PF: predicated region fallthrough
CT: control target
= control target key end

     0   :  { %v752_v2 = vmov 0   ;;  %s997_s0 = inlined_call_operand.vmem [shape: f32[1,8], index: 0, kind: input, shape index: {}]   ;;  %s998_s1 = inlined_call_operand.vmem [shape: f32[64,1], index: 1, kind: input, shape index: {}]   ;;  %s999_s2 = inlined_call_operand.vmem [shape: f32[64,1], index: 2, kind: input, shape index: {}]   ;;  %s1000_s3 = inlined_call_operand.vmem [shape: f32[128,64], index: 3, kind: input, shape index: {}]   ;;  %s1001_s4 = inlined_call_operand.vmem [shape: f32[128,1], index: 4, kind: input, shape index: {}]   ;;  %s1002_s5 = inlined_call_operand.vmem [shape: f32[2,128], index: 5, kind: input, shape index: {}]   ;;  %s1003_s6 = inlined_call_operand.vmem [shape: f32[2,1], index: 6, kind: input, shape index: {}]   ;;  %s1004_s7 = inlined_call_operand.hbm [shape: f32[2,8], index: 7, kind: output, shape index: {}]  }
   0x1   :  { %v97_v0 = vld [vmem:[%s999_s2 + $0x38] sm:$0xff]  ;;  %725 = vset.pattern.permute.xlu1 %v752_v2  ;;  %724 = vset.pattern.permute.xlu0 %v752_v2  ;;  %v34_v3 = vld [vmem:[%s998_s1 + $0x30] sm:$0xff]  ;;  %v33_v4 = vld [vmem:[%s998_s1 + $0x28] sm:$0xff] }
   0x2   :  { %v35_v1 = vld [vmem:[%s998_s1 + $0x38] sm:$0xff]  ;;  %135 = vperm.xlu1 %725, %v97_v0   ;;  %v96_v5 = vld [vmem:[%s999_s2 + $0x30] sm:$0xff]  ;;  %v32_v6 = vld [vmem:[%s998_s1 + $0x20] sm:$0xff] }
   0x3   :  { %73 = vperm.xlu0 %724, %v35_v1   ;;  %v95_v7 = vld [vmem:[%s999_s2 + $0x28] sm:$0xff]  ;;  %v31_v8 = vld [vmem:[%s998_s1 + $0x18] sm:$0xff] }
   0x6   :  { %63 = vperm.xlu1 %725, %v33_v4  }
   0x7   :  { %68 = vperm.xlu0 %724, %v34_v3  }
   0xa   :  { %58 = vperm.xlu1 %725, %v32_v6  }
   0xb   :  { %130 = vperm.xlu0 %724, %v96_v5  }
   0xc   :  { %12 = vsyncpa [#allocation3], 0  ;;  %v94_v9 = vld [vmem:[%s999_s2 + $0x20] sm:$0xff]  ;;  %v30_v10 = vld [vmem:[%s998_s1 + $0x10] sm:$0xff]  ;;  %vm266_vm0 = vcmask 523264   ;;  %vm754_vm1 = vmmov 0  }
   0xd   :  { %v93_v11 = vld [vmem:[%s999_s2 + $0x18] sm:$0xff]  ;;  %v29_v12 = vld [vmem:[%s998_s1 + $0x8] sm:$0xff]  ;;  %v92_v13 = vld [vmem:[%s999_s2 + $0x10] sm:$0xff]  ;;  %vm571_vm5 = vcmask 58368  }
   0xe   :  { %53 = vperm.xlu1 %725, %v31_v8   ;;  %v28_v14 = vld [vmem:[%s998_s1] sm:$0xff]  ;;  %v91_v15 = vld [vmem:[%s999_s2 + $0x8] sm:$0xff]  ;;  %v185_v17 = vld [vmem:[%s1001_s4 + $0x78] sm:$0xff] }
   0xf   :  { %125 = vperm.xlu0 %724, %v95_v7   ;;  %v90_v16 = vld [vmem:[%s999_s2] sm:$0xff]  ;;  %v184_v18 = vld [vmem:[%s1001_s4 + $0x70] sm:$0xff]  ;;  %v183_v20 = vld [vmem:[%s1001_s4 + $0x68] sm:$0xff] }
  0x10   :  { %v154_v19 = vld [vmem:[%s1000_s3] sm:$0xff]  ;;  %v181_v22 = vld [vmem:[%s1001_s4 + $0x58] sm:$0xff]  ;;  %v180_v23 = vld [vmem:[%s1001_s4 + $0x50] sm:$0xff] }
  0x11   :  { %661 = vmatprep.mubr.msk.f32.mxu0 %vm266_vm0, %v154_v19  ;;  %v182_v21 = vld [vmem:[%s1001_s4 + $0x60] sm:$0xff]  ;;  %v179_v24 = vld [vmem:[%s1001_s4 + $0x48] sm:$0xff]  ;;  %v177_v26 = vld [vmem:[%s1001_s4 + $0x38] sm:$0xff] }
  0x12   :  { %48 = vperm.xlu1 %725, %v30_v10   ;;  %v178_v25 = vld [vmem:[%s1001_s4 + $0x40] sm:$0xff]  ;;  %v176_v27 = vld [vmem:[%s1001_s4 + $0x30] sm:$0xff]  ;;  %v175_v28 = vld [vmem:[%s1001_s4 + $0x28] sm:$0xff] }
  0x13   :  { %120 = vperm.xlu0 %724, %v94_v9   ;;  %v174_v29 = vld [vmem:[%s1001_s4 + $0x20] sm:$0xff]  ;;  %v173_v30 = vld [vmem:[%s1001_s4 + $0x18] sm:$0xff]  ;;  %v172_v31 = vld [vmem:[%s1001_s4 + $0x10] sm:$0xff] }
  0x14   :  { %v171_v32 = vld [vmem:[%s1001_s4 + $0x8] sm:$0xff]  ;;  %v170_v33 = vld [vmem:[%s1001_s4] sm:$0xff] }
  0x15   :  { %v477_v34 = vld [vmem:[%s1003_s6] sm:$0x3] }
  0x16   :  { %43 = vperm.xlu1 %725, %v29_v12   ;;  %v587_v35 = vld [vmem:[%s997_s0] ss:$0 sm:$0xff]  ;;  %v155_v12 = vld [vmem:[%s1000_s3 + $0x8] sm:$0xff] }
  0x17   :  { %115 = vperm.xlu0 %724, %v93_v11   ;;  %v162_v19 = vld [vmem:[%s1000_s3 + $0x40] sm:$0xff] }
  0x1a   :  { %38 = vperm.xlu1 %725, %v28_v14   ;;  %v157_v14 = vld [vmem:[%s1000_s3 + $0x18] sm:$0xff] }
  0x1b   :  { %110 = vperm.xlu0 %724, %v92_v13   ;;  %v156_v13 = vld [vmem:[%s1000_s3 + $0x10] sm:$0xff] }
  0x1e   :  { %100 = vperm.xlu1 %725, %v90_v16   ;;  %v159_v16 = vld [vmem:[%s1000_s3 + $0x28] sm:$0xff] }
  0x1f   :  { %105 = vperm.xlu0 %724, %v91_v15   ;;  %v158_v15 = vld [vmem:[%s1000_s3 + $0x20] sm:$0xff] }
  0x22   :  { %258 = vperm.xlu1 %725, %v184_v18   ;;  %v161_v18 = vld [vmem:[%s1000_s3 + $0x38] sm:$0xff] }
  0x23   :  { %263 = vperm.xlu0 %724, %v185_v17   ;;  %v160_v17 = vld [vmem:[%s1000_s3 + $0x30] sm:$0xff] }
  0x26   :  { %248 = vperm.xlu1 %725, %v182_v21   ;;  %v164_v21 = vld [vmem:[%s1000_s3 + $0x50] sm:$0xff] }
  0x27   :  { %253 = vperm.xlu0 %724, %v183_v20   ;;  %v163_v20 = vld [vmem:[%s1000_s3 + $0x48] sm:$0xff] }
  0x2a   :  { %238 = vperm.xlu1 %725, %v180_v23   ;;  %v166_v23 = vld [vmem:[%s1000_s3 + $0x60] sm:$0xff] }
  0x2b   :  { %243 = vperm.xlu0 %724, %v181_v22   ;;  %v165_v22 = vld [vmem:[%s1000_s3 + $0x58] sm:$0xff] }
  0x2e   :  { %228 = vperm.xlu1 %725, %v178_v25   ;;  %v168_v25 = vld [vmem:[%s1000_s3 + $0x70] sm:$0xff] }
  0x2f   :  { %233 = vperm.xlu0 %724, %v179_v24   ;;  %v167_v24 = vld [vmem:[%s1000_s3 + $0x68] sm:$0xff] }
  0x32   :  { %218 = vperm.xlu1 %725, %v176_v27   ;;  %v753_v27 = vmov 0.0  }
  0x33   :  { %223 = vperm.xlu0 %724, %v177_v26   ;;  %v169_v26 = vld [vmem:[%s1000_s3 + $0x78] sm:$0xff]  ;;  %685 = vmatprep.subr.mxu1 %v753_v27 }
  0x34   :  { %717 = vmatprep.mubr.msk.f32.mxu1 %vm754_vm1, %v753_v27 }
  0x36   :  { %208 = vperm.xlu1 %725, %v174_v29  }
  0x37   :  { %213 = vperm.xlu0 %724, %v175_v28  }
  0x3a   :  { %198 = vperm.xlu1 %725, %v172_v31  }
  0x3b   :  { %203 = vperm.xlu0 %724, %v173_v30  }
  0x3e   :  { %188 = vperm.xlu1 %725, %v170_v33  }
  0x3f   :  { %193 = vperm.xlu0 %724, %v171_v32  }
  0x43   :  { %480 = vperm.xlu0 %724, %v477_v34  }
  0x7d   :  { %v136_v36 = vpop.permute.xlu1 %135 }
  0x7e   :  { %v74_v37 = vpop.permute.xlu0 %73 }
  0x7f   :  { %v89_v38 = vmul.f32 %v587_v35, %v74_v37 }
  0x81   :  { %v145_v39 = vadd.f32 %v136_v36, %v89_v38  ;;  %v64_v41 = vpop.permute.xlu1 %63 }
  0x82   :  { %v69_v40 = vpop.permute.xlu0 %68  ;;  %v87_v47 = vmul.f32 %v587_v35, %v64_v41 }
  0x83   :  { %v153_v42 = vmax.f32 %v145_v39, 0.0  ;;  %v88_v43 = vmul.f32 %v587_v35, %v69_v40 }
  0x85   :  { %645 = vmatprep.subr.mxu0 %v153_v42  ;;  %v59_v45 = vpop.permute.xlu1 %58 }
  0x86   :  { %v131_v44 = vpop.permute.xlu0 %130  ;;  %646 = vmatpush3.msra.mxu0 %v153_v42  ;;  %v86_v52 = vmul.f32 %v587_v35, %v59_v45 }
  0x87   :  { %v144_v46 = vadd.f32 %v131_v44, %v88_v43 }
  0x89   :  { %v152_v48 = vmax.f32 %v144_v46, 0.0  ;;  %v54_v50 = vpop.permute.xlu1 %53 }
  0x8a   :  { %v126_v49 = vpop.permute.xlu0 %125  ;;  %v85_v57 = vmul.f32 %v587_v35, %v54_v50 }
  0x8b   :  { %v143_v51 = vadd.f32 %v126_v49, %v87_v47  ;;  %647 = vmatprep.subr.mxu0 %v152_v48 }
  0x8c   :  { %648 = vmatpush3.msra.mxu0 %v152_v48 }
  0x8d   :  { %v151_v53 = vmax.f32 %v143_v51, 0.0  ;;  %v49_v55 = vpop.permute.xlu1 %48 }
  0x8e   :  { %v121_v54 = vpop.permute.xlu0 %120  ;;  %v84_v62 = vmul.f32 %v587_v35, %v49_v55 }
  0x8f   :  { %v142_v56 = vadd.f32 %v121_v54, %v86_v52  ;;  %649 = vmatprep.subr.mxu0 %v151_v53 }
  0x90   :  { %650 = vmatpush3.msra.mxu0 %v151_v53 }
  0x91   :  { %v150_v58 = vmax.f32 %v142_v56, 0.0  ;;  %v44_v60 = vpop.permute.xlu1 %43 }
  0x92   :  { %v116_v59 = vpop.permute.xlu0 %115  ;;  %v83_v3 = vmul.f32 %v587_v35, %v44_v60 }
  0x93   :  { %v141_v61 = vadd.f32 %v116_v59, %v85_v57  ;;  %651 = vmatprep.subr.mxu0 %v150_v58 }
  0x94   :  { %652 = vmatpush3.msra.mxu0 %v150_v58 }
  0x95   :  { %v149_v63 = vmax.f32 %v141_v61, 0.0  ;;  %v39_v1 = vpop.permute.xlu1 %38 }
  0x96   :  { %v111_v0 = vpop.permute.xlu0 %110  ;;  %v82_v5 = vmul.f32 %v587_v35, %v39_v1 }
  0x97   :  { %v140_v2 = vadd.f32 %v111_v0, %v84_v62  ;;  %653 = vmatprep.subr.mxu0 %v149_v63 }
  0x98   :  { %654 = vmatpush3.msra.mxu0 %v149_v63 }
  0x99   :  { %v148_v4 = vmax.f32 %v140_v2, 0.0  ;;  %v101_v7 = vpop.permute.xlu1 %100 }
  0x9a   :  { %v106_v6 = vpop.permute.xlu0 %105  ;;  %v138_v9 = vadd.f32 %v101_v7, %v82_v5 }
  0x9b   :  { %v139_v8 = vadd.f32 %v106_v6, %v83_v3  ;;  %655 = vmatprep.subr.mxu0 %v148_v4 }
  0x9c   :  { %656 = vmatpush3.msra.mxu0 %v148_v4  ;;  %v146_v11 = vmax.f32 %v138_v9, 0.0 }
  0x9d   :  { %v147_v10 = vmax.f32 %v139_v8, 0.0  ;;  %v259_v36 = vpop.permute.xlu1 %258 }
  0x9e   :  { %v264_v34 = vpop.permute.xlu0 %263 }
  0x9f   :  { %657 = vmatprep.subr.mxu0 %v147_v10 }
  0xa0   :  { %658 = vmatpush3.msra.mxu0 %v147_v10 }
  0xa1   :  { %659 = vmatprep.subr.mxu0 %v146_v11  ;;  %v249_v41 = vpop.permute.xlu1 %248 }
  0xa2   :  { %660 = vmatpush3.msra.mxu0 %v146_v11  ;;  %v254_v39 = vpop.permute.xlu0 %253 }
  0xa3   :  { %662 = vmatmul.mubr.msk.f32.vlgmr.msra.gmra.mxu0 %vm266_vm0, %v155_v12 }
  0xa4   :  { %664 = vmatprep.mubr.msk.f32.mxu0 %vm266_vm0, %v156_v13 }
  0xa5   :  { %v239_v46 = vpop.permute.xlu1 %238 }
  0xa6   :  { %v244_v44 = vpop.permute.xlu0 %243 }
  0xa7   :  { %665 = vmatmul.mubr.msk.f32.gmra.mxu0 %vm266_vm0, %v157_v14 }
  0xa8   :  { %667 = vmatprep.mubr.msk.f32.mxu0 %vm266_vm0, %v158_v15 }
  0xa9   :  { %v229_v55 = vpop.permute.xlu1 %228 }
  0xaa   :  { %v234_v50 = vpop.permute.xlu0 %233 }
  0xab   :  { %668 = vmatmul.mubr.msk.f32.gmra.mxu0 %vm266_vm0, %v159_v16 }
  0xac   :  { %670 = vmatprep.mubr.msk.f32.mxu0 %vm266_vm0, %v160_v17 }
  0xad   :  { %v219_v63 = vpop.permute.xlu1 %218 }
  0xae   :  { %v224_v60 = vpop.permute.xlu0 %223 }
  0xaf   :  { %671 = vmatmul.mubr.msk.f32.gmra.mxu0 %vm266_vm0, %v161_v18 }
  0xb0   :  { %673 = vmatprep.mubr.msk.f32.mxu0 %vm266_vm0, %v162_v19 }
  0xb1   :  { %v209_v7 = vpop.permute.xlu1 %208 }
  0xb2   :  { %v214_v4 = vpop.permute.xlu0 %213 }
  0xb3   :  { %674 = vmatmul.mubr.msk.f32.gmra.mxu0 %vm266_vm0, %v163_v20 }
  0xb4   :  { %676 = vmatprep.mubr.msk.f32.mxu0 %vm266_vm0, %v164_v21 }
  0xb5   :  { %v199_v15 = vpop.permute.xlu1 %198 }
  0xb6   :  { %v204_v12 = vpop.permute.xlu0 %203 }
  0xb7   :  { %677 = vmatmul.mubr.msk.f32.gmra.mxu0 %vm266_vm0, %v165_v22 }
  0xb8   :  { %679 = vmatprep.mubr.msk.f32.mxu0 %vm266_vm0, %v166_v23 }
  0xb9   :  { %v189_v23 = vpop.permute.xlu1 %188 }
  0xba   :  { %v194_v20 = vpop.permute.xlu0 %193 }
  0xbb   :  { %680 = vmatmul.mubr.msk.f32.gmra.mxu0 %vm266_vm0, %v167_v24 }
  0xbc   :  { %682 = vmatprep.mubr.msk.f32.mxu0 %vm266_vm0, %v168_v25 }
  0xbf   :  { %683 = vmatmul.mubr.msk.f32.gmra.mxu0 %vm266_vm0, %v169_v26 }
 0x163   :  { %v964_v28 = vpop.f32.mrf.mxu0 }
 0x164   :  { %v387_v21 = vadd.f32 %v964_v28, %v194_v20  ;;  %v476_v28 = vld [vmem:[%s1002_s5] sm:$0x3]  ;;  %s755_s5 = smov [#allocation2]  }
 0x165   :  { %v966_v29 = vpop.f32.mrf.mxu0  ;;  %s579_s21 = sshll.u32 %s755_s5, 4  ;;  %s580_s21 = int_to_ptr.vmem [resolvable:$true] %s579_s21 }
 0x166   :  { %v382_v24 = vadd.f32 %v966_v29, %v189_v23  ;;  %v461_v26 = vmax.f32 %v387_v21, 0.0  ;;  %s730_s22 = scalar_lea.vmem %s580_s21, 32  ;;  %p735_p1 = scmp.lt.s32.totalorder %s580_s21, %s580_s21 }
 0x167   :  { %v968_v30 = vpop.f32.mrf.mxu0  ;;  %p731_p0 = scmp.ne.s32.totalorder %s580_s21, %s730_s22  ;;  %p736_p2 = scmp.lt.s32.totalorder %s730_s22, %s730_s22 }
 0x168   :  { %v397_v16 = vadd.f32 %v968_v30, %v204_v12  ;;  %v460_v30 = vmax.f32 %v382_v24, 0.0 }
 0x169   :  { %v970_v31 = vpop.f32.mrf.mxu0  ;;  %p737_p3 = por %p736_p2, %p735_p1 }
 0x16a   :  { %v392_v18 = vadd.f32 %v970_v31, %v199_v15  ;;  %v463_v22 = vmax.f32 %v397_v16, 0.0  ;;  %v481_v31 = vpop.permute.xlu0 %480 }
 0x16b   :  { %v669_v32 = vpop.f32.mrf.mxu0  ;;  %p738_p4 = pnand %p737_p3, %p731_p0 }
 0x16c   :  { %v407_v10 = vadd.f32 %v669_v32, %v214_v4  ;;  %v462_v25 = vmax.f32 %v392_v18, 0.0 }
 0x16d   :  { %v401_v33 = vpop.f32.mrf.mxu0 }
 0x16e   :  { %v402_v13 = vadd.f32 %v401_v33, %v209_v7  ;;  %v465_v17 = vmax.f32 %v407_v10, 0.0 }
 0x16f   :  { %v672_v35 = vpop.f32.mrf.mxu0 }
 0x170   :  { %v417_v5 = vadd.f32 %v672_v35, %v224_v60  ;;  %v464_v19 = vmax.f32 %v402_v13, 0.0 }
 0x171   :  { %v411_v37 = vpop.f32.mrf.mxu0 }
 0x172   :  { %v412_v8 = vadd.f32 %v411_v37, %v219_v63  ;;  %v467_v11 = vmax.f32 %v417_v5, 0.0 }
 0x173   :  { %v675_v38 = vpop.f32.mrf.mxu0 }
 0x174   :  { %v427_v0 = vadd.f32 %v675_v38, %v234_v50  ;;  %v466_v14 = vmax.f32 %v412_v8, 0.0 }
 0x175   :  { %v421_v40 = vpop.f32.mrf.mxu0 }
 0x176   :  { %v422_v2 = vadd.f32 %v421_v40, %v229_v55  ;;  %v469_v6 = vmax.f32 %v427_v0, 0.0 }
 0x177   :  { %v678_v42 = vpop.f32.mrf.mxu0 }
 0x178   :  { %v437_v58 = vadd.f32 %v678_v42, %v244_v44  ;;  %v468_v9 = vmax.f32 %v422_v2, 0.0 }
 0x179   :  { %v431_v43 = vpop.f32.mrf.mxu0 }
 0x17a   :  { %v432_v61 = vadd.f32 %v431_v43, %v239_v46  ;;  %v471_v1 = vmax.f32 %v437_v58, 0.0 }
 0x17b   :  { %v681_v45 = vpop.f32.mrf.mxu0 }
 0x17c   :  { %v447_v52 = vadd.f32 %v681_v45, %v254_v39  ;;  %v470_v3 = vmax.f32 %v432_v61, 0.0  ;;  %v567_v39 = vlaneseq }
 0x17d   :  { %v441_v47 = vpop.f32.mrf.mxu0 }
 0x17e   :  { %v442_v56 = vadd.f32 %v441_v47, %v249_v41  ;;  %v473_v59 = vmax.f32 %v447_v52, 0.0  ;;  %v568_v42 = vshrl.u32 %v567_v39, 7 }
 0x17f   :  { %v684_v48 = vpop.f32.mrf.mxu0 }
 0x180   :  { %v457_v49 = vadd.f32 %v684_v48, %v264_v34  ;;  %v472_v62 = vmax.f32 %v442_v56, 0.0  ;;  %vm569_vm3 = vcmp.eq.s32.totalorder %v568_v42, 0 }
 0x181   :  { %v451_v51 = vpop.f32.mrf.mxu0 }
 0x182   :  { %v475_v53 = vmax.f32 %v457_v49, 0.0  ;;  %v452_v54 = vadd.f32 %v451_v51, %v259_v36 }
 0x184   :  { %v474_v57 = vmax.f32 %v452_v54, 0.0  ;;  %686 = vmatpush3.msra.mxu1 %v475_v53 }
 0x185   :  { %687 = vmatprep.subr.mxu1 %v753_v27 }
 0x186   :  { %688 = vmatpush3.msra.mxu1 %v474_v57 }
 0x187   :  { %689 = vmatprep.subr.mxu1 %v753_v27 }
 0x188   :  { %690 = vmatpush3.msra.mxu1 %v473_v59 }
 0x189   :  { %691 = vmatprep.subr.mxu1 %v753_v27 }
 0x18a   :  { %692 = vmatpush3.msra.mxu1 %v472_v62 }
 0x18b   :  { %693 = vmatprep.subr.mxu1 %v753_v27 }
 0x18c   :  { %694 = vmatpush3.msra.mxu1 %v471_v1 }
 0x18d   :  { %695 = vmatprep.subr.mxu1 %v753_v27 }
 0x18e   :  { %696 = vmatpush3.msra.mxu1 %v470_v3 }
 0x18f   :  { %697 = vmatprep.subr.mxu1 %v753_v27 }
 0x190   :  { %698 = vmatpush3.msra.mxu1 %v469_v6 }
 0x191   :  { %699 = vmatprep.subr.mxu1 %v753_v27 }
 0x192   :  { %700 = vmatpush3.msra.mxu1 %v468_v9 }
 0x193   :  { %701 = vmatprep.subr.mxu1 %v753_v27 }
 0x194   :  { %702 = vmatpush3.msra.mxu1 %v467_v11 }
 0x195   :  { %703 = vmatprep.subr.mxu1 %v753_v27 }
 0x196   :  { %704 = vmatpush3.msra.mxu1 %v466_v14 }
 0x197   :  { %705 = vmatprep.subr.mxu1 %v753_v27 }
 0x198   :  { %706 = vmatpush3.msra.mxu1 %v465_v17 }
 0x199   :  { %707 = vmatprep.subr.mxu1 %v753_v27 }
 0x19a   :  { %708 = vmatpush3.msra.mxu1 %v464_v19 }
 0x19b   :  { %709 = vmatprep.subr.mxu1 %v753_v27 }
 0x19c   :  { %710 = vmatpush3.msra.mxu1 %v463_v22 }
 0x19d   :  { %711 = vmatprep.subr.mxu1 %v753_v27 }
 0x19e   :  { %712 = vmatpush3.msra.mxu1 %v462_v25 }
 0x19f   :  { %713 = vmatprep.subr.mxu1 %v753_v27 }
 0x1a0   :  { %714 = vmatpush3.msra.mxu1 %v461_v26 }
 0x1a1   :  { %715 = vmatprep.subr.mxu1 %v753_v27 }
 0x1a2   :  { %716 = vmatpush3.msra.mxu1 %v460_v30 }
 0x1a3   :  { %718 = vmatmul.mubr.f32.vlgmr.msra.gmra.mxu1 %v476_v28 }
 0x263   :  { %v549_v29 = vpop.f32.mrf.mxu1 }
 0x264   :  { %v550_v32 = vadd.f32 %v549_v29, %v481_v31 }
 0x265   :  { %v719_v33 = vpop.f32.mrf.mxu1 }
 0x266   :  { %v554_v34 = vmin.f32 %v550_v32, 20.0  ;;  %vm553_vm4 = vcmp.gt.f32.partialorder %v550_v32, 20.0 }
 0x268   :  { %v555_v35 = vmul.f32 1.442695, %v554_v34 }
 0x26a   :  { %726 = vpow2.f32 %v555_v35 }
 0x277   :  { %v727_v36 = vpop.eup %726 }
 0x278   :  { %v557_v37 = vadd.f32 1.0, %v727_v36  ;;  %v560_v38 = vmul.f32 -0.5, %v727_v36  ;;  %v563_v41 = vand.u32 2147483647, %v727_v36 }
 0x27a   :  { %728 = vlog2.f32 %v557_v37  ;;  %v561_v40 = vadd.f32 1.0, %v560_v38  ;;  %vm564_vm2 = vcmp.lt.f32.partialorder %v563_v41, 0.0004427343 }
 0x27c   :  { %v562_v27 = vmul.f32 %v727_v36, %v561_v40 }
 0x287   :  { %v729_v43 = vpop.eup %728 }
 0x288   :  { %v559_v44 = vmul.f32 0.6931472, %v729_v43 }
 0x28a   :  { %v565_v45 = vsel %vm564_vm2, %v562_v27, %v559_v44 }
 0x28b   :  { %v566_v46 = vsel %vm553_vm4, %v550_v32, %v565_v45 }
 0x28c   :  { %v570_v47 = vsel %vm569_vm3, %v550_v32, %v566_v46 }
 0x28d   :  { %572 = vst.msk [vmem:[#allocation2] sm:$0x3] %vm571_vm5, %v570_v47 }
 0x28e   :  { %741 = shalt.err (!%p738_p4)
}
 0x28f   :  { %582 = dma.vmem_to_hbm [thread:$0]  %s580_s21, 32, %s1004_s7, [#allocation3]  }
 0x290   :  { %750 = dma.done.wait [#allocation3], 32  }
 0x291   :  { %751 = vsyncadd [#allocation3], 4294967264 }
 0x292   :  { %586 = vsyncpa [#allocation3], 1 }

</bundles_post_ra>
